<compile_context>
chip_gen: v6e
topology: v6e:2x2x1
jax: 0.10.0
libtpu: 0.0.40
codegen_flags: <defaults>
</compile_context>

<pallas_src>
import functools

import jax
import jax.numpy as jnp
from jax.experimental import pallas as pl
from jax.experimental.pallas import tpu as pltpu


def _round_up(x: int, m: int) -> int:
    return ((x + m - 1) // m) * m


def _tokenizer_kernel(x_ref, w_ref, b_ref, o_ref):
    # x_ref: (TM, K) bf16, w_ref: (K, D) bf16 (VMEM-resident, constant index_map),
    # b_ref: (1, D) f32, o_ref: (TM, D) out_dtype.
    acc = jnp.dot(x_ref[...], w_ref[...], preferred_element_type=jnp.float32)
    o_ref[...] = (acc + b_ref[...]).astype(o_ref.dtype)


def _vmem_capacity_bytes() -> int:
    """Generation-aware VMEM capacity; conservative (v7x) fallback."""
    try:
        return int(pltpu.get_tpu_info().vmem_capacity_bytes)
    except Exception:
        return 64 * 1024 * 1024


def _tile_vmem_need(tm: int, K: int, D: int, in_isz: int, out_isz: int) -> int:
    # double-buffered patch tiles + (default) double-buffered resident weight
    # + bias + double-buffered output tiles
    return (2 * tm * K + 2 * K * D) * in_isz + 2 * D * 4 + 2 * tm * D * out_isz


def _choose_tm(M: int, K: int, D: int, in_isz: int, out_isz: int, vmem_cap: int):
    """Pick (TM, Mp). Prefer TM that makes the post-kernel slice a no-op."""
    target = 1024 if vmem_cap >= (100 << 20) else 512
    while target > 128 and _tile_vmem_need(target, K, D, in_isz, out_isz) > int(vmem_cap * 0.6):
        target //= 2
    if M <= target:
        return M, M                      # single tile spanning the full M -> no pad, no slice
    # largest multiple-of-16 divisor of M not exceeding target -> Mp == M
    for tm in range(target - (target % 16), 15, -16):
        if M % tm == 0:
            return tm, M
    # no clean divisor: pad M and slice afterwards
    return target, _round_up(M, target)


@functools.partial(jax.jit, static_argnames=("patch_size", "out_dtype"))
def tokenizer_forward(x, conv_weight, conv_bias, patch_size, out_dtype=None):
    """x: (B, C, H, W) NCHW float32
    conv_weight: (D, C, P, P)  (PyTorch Conv2d layout)
    conv_bias:   (D,)
    returns: (B, N, D) with N = (H//P) * (W//P), dtype = out_dtype (default x.dtype)
    """
    compute_dtype = jnp.bfloat16

    B, C, H, W = x.shape
    D = conv_weight.shape[0]
    P = patch_size
    assert H % P == 0 and W % P == 0, "spatial dims must be divisible by patch_size"
    Hp, Wp = H // P, W // P
    N = Hp * Wp
    K = C * P * P
    M = B * N

    out_dtype = jnp.dtype(out_dtype) if out_dtype is not None else jnp.dtype(x.dtype)
    in_isz = jnp.dtype(compute_dtype).itemsize
    out_isz = out_dtype.itemsize

    vmem_cap = _vmem_capacity_bytes()
    TM, Mp = _choose_tm(M, K, D, in_isz, out_isz, vmem_cap)

    # --- layout plumbing (plain JAX) ---
    # Cast to bf16 FIRST so the 6-D transpose moves half the bytes.
    xb = x.astype(compute_dtype)
    # (B, C, Hp, P, Wp, P) -> (B, Hp, Wp, C, P, P) -> (M, K); K ordering (c, ph, pw)
    # matches conv_weight.reshape(D, K).
    patches = xb.reshape(B, C, Hp, P, Wp, P).transpose(0, 2, 4, 1, 3, 5).reshape(M, K)
    if Mp != M:
        patches = jnp.pad(patches, ((0, Mp - M), (0, 0)))

    w_mat = conv_weight.astype(compute_dtype).reshape(D, K).T        # (K, D) bf16
    b_mat = conv_bias.reshape(1, D).astype(jnp.float32)              # (1, D) f32

    grid = (Mp // TM,)

    vmem_need = _tile_vmem_need(TM, K, D, in_isz, out_isz)
    vmem_limit = min(max(2 * vmem_need, 32 << 20), int(vmem_cap * 3 // 4))
    vmem_limit = max(vmem_limit, vmem_need + (1 << 20))   # never below the need
    vmem_limit = min(vmem_limit, vmem_cap)                # never above physical

    cost = pl.CostEstimate(
        flops=2 * Mp * K * D,
        transcendentals=0,
        bytes_accessed=Mp * K * in_isz + K * D * in_isz + D * 4 + Mp * D * out_isz,
    )

    out = pl.pallas_call(
        _tokenizer_kernel,
        out_shape=jax.ShapeDtypeStruct((Mp, D), out_dtype),
        grid_spec=pltpu.PrefetchScalarGridSpec(
            num_scalar_prefetch=0,
            grid=grid,
            in_specs=[
                pl.BlockSpec((TM, K), lambda i: (i, 0)),   # patch tiles (pipelined)
                pl.BlockSpec((K, D), lambda i: (0, 0)),    # weight (VMEM-resident)
                pl.BlockSpec((1, D), lambda i: (0, 0)),    # bias   (VMEM-resident)
            ],
            out_specs=pl.BlockSpec((TM, D), lambda i: (i, 0)),
        ),
        compiler_params=pltpu.CompilerParams(
            dimension_semantics=("parallel",),             # v7x: shard M over 2 TCs
            vmem_limit_bytes=int(vmem_limit),
        ),
        cost_estimate=cost,
    )(patches, w_mat, b_mat)

    if Mp != M:
        out = out[:M]
    return out.reshape(B, N, D)


def _reference_forward(x, conv_weight, conv_bias, patch_size):
    """Pure-JAX f32 reference (strided conv + flatten + transpose)."""
    y = jax.lax.conv_general_dilated(
        x, conv_weight,
        window_strides=(patch_size, patch_size),
        padding="VALID",
        dimension_numbers=("NCHW", "OIHW", "NCHW"),
    )
    y = y + conv_bias.reshape(1, -1, 1, 1)
    B, D, Hp, Wp = y.shape
    return y.reshape(B, D, Hp * Wp).transpose(0, 2, 1)


if __name__ == "__main__":
    # Small shapes consistent with the module: batch=2, in_channels=4,
    # spatial=16, patch_size=4, token_dim=32.
    B, C, H, W = 2, 4, 16, 16
    P = 4
    D = 32

    key = jax.random.PRNGKey(0)
    kx, kw, kb = jax.random.split(key, 3)

    x = jax.random.normal(kx, (B, C, H, W), dtype=jnp.float32)

    # Deterministic PyTorch-style uniform init in [-1/sqrt(fan_in), +].
    fan_in = C * P * P
    bound = 1.0 / (fan_in ** 0.5)
    conv_weight = jax.random.uniform(kw, (D, C, P, P), jnp.float32, -bound, bound)
    conv_bias = jax.random.uniform(kb, (D,), jnp.float32, -bound, bound)

    out = tokenizer_forward(x, conv_weight, conv_bias, P)
    out = jax.block_until_ready(out)

    ref = _reference_forward(x, conv_weight, conv_bias, P)
    assert out.shape == (B, (H // P) * (W // P), D)
    assert out.dtype == jnp.float32
    # bf16 inputs with f32 accumulation -> relaxed tolerance vs the f32 conv.
    assert jnp.allclose(out, ref, atol=3e-2, rtol=3e-2), "mismatch vs reference"

    print("KERNEL_OK")
</pallas_src>

<mosaic_0001>
module attributes {stable_mosaic.version = 11 : i64} {
  func.func @_tokenizer_kernel(%arg0: i32, %arg1: memref<32x64xbf16, #tpu.memory_space<vmem>>, %arg2: memref<64x32xbf16, #tpu.memory_space<vmem>>, %arg3: memref<1x32xf32, #tpu.memory_space<vmem>>, %arg4: memref<32x32xf32, #tpu.memory_space<vmem>>) attributes {dimension_semantics = [#tpu.dimension_semantics<parallel>], iteration_bounds = array<i64: 1>, scalar_prefetch = 0 : i64, scratch_operands = 0 : i64, tpu.core_type = #tpu.core_type<tc>, window_params = [{transform_indices = @transform_0, window_bounds = array<i64: 32, 64>}, {pipeline_mode = #tpu.pipeline_mode<synchronous>, transform_indices = @transform_1, window_bounds = array<i64: 64, 32>}, {pipeline_mode = #tpu.pipeline_mode<synchronous>, transform_indices = @transform_2, window_bounds = array<i64: 1, 32>}, {transform_indices = @transform_3, window_bounds = array<i64: 32, 32>}]} {
    %c0 = arith.constant 0 : index
    %c0_0 = arith.constant 0 : index
    %0 = vector.load %arg1[%c0, %c0_0] : memref<32x64xbf16, #tpu.memory_space<vmem>>, vector<32x64xbf16>
    %c0_1 = arith.constant 0 : index
    %c0_2 = arith.constant 0 : index
    %1 = vector.load %arg2[%c0_1, %c0_2] : memref<64x32xbf16, #tpu.memory_space<vmem>>, vector<64x32xbf16>
    %cst = arith.constant dense<0.000000e+00> : vector<32x32xf32>
    %2 = tpu.matmul %0, %1, %cst {dimension_numbers = #tpu.dot_dimension_numbers<[1], [0], [0], [1], [0, 0, 1, 1], [], []>} : vector<32x64xbf16>, vector<64x32xbf16>, vector<32x32xf32> -> vector<32x32xf32>
    %c0_3 = arith.constant 0 : index
    %c0_4 = arith.constant 0 : index
    %3 = vector.load %arg3[%c0_3, %c0_4] : memref<1x32xf32, #tpu.memory_space<vmem>>, vector<1x32xf32>
    %4 = vector.broadcast %3 : vector<1x32xf32> to vector<32x32xf32>
    %5 = arith.addf %2, %4 : vector<32x32xf32>
    %c0_5 = arith.constant 0 : index
    %c0_6 = arith.constant 0 : index
    %6 = vector.load %arg4[%c0_5, %c0_6] : memref<32x32xf32, #tpu.memory_space<vmem>>, vector<32x32xf32>
    tpu.vector_store %arg4[%c0_5, %c0_6], %5 {strides = array<i32>} : memref<32x32xf32, #tpu.memory_space<vmem>>, vector<32x32xf32>,
    return
  }
  func.func @transform_0(%arg0: i32) -> (i32, i32) {
    %c0_i32 = arith.constant 0 : i32
    %c0_i32_0 = arith.constant 0 : i32
    return %arg0, %c0_i32 : i32, i32
  }
  func.func @transform_1(%arg0: i32) -> (i32, i32) {
    %c0_i32 = arith.constant 0 : i32
    %c0_i32_0 = arith.constant 0 : i32
    %c0_i32_1 = arith.constant 0 : i32
    return %c0_i32, %c0_i32_0 : i32, i32
  }
  func.func @transform_2(%arg0: i32) -> (i32, i32) {
    %c0_i32 = arith.constant 0 : i32
    %c0_i32_0 = arith.constant 0 : i32
    %c0_i32_1 = arith.constant 0 : i32
    return %c0_i32, %c0_i32_0 : i32, i32
  }
  func.func @transform_3(%arg0: i32) -> (i32, i32) {
    %c0_i32 = arith.constant 0 : i32
    %c0_i32_0 = arith.constant 0 : i32
    return %arg0, %c0_i32 : i32, i32
  }
}

</mosaic_0001>

<bundles_post_ra>
// kernel: tokenizer_forward.1
= control target key start
LH: loop header
LB: loop body
LE: loop exit
PB: predicated region body
PF: predicated region fallthrough
CT: control target
= control target key end

     0   :  { %vm69_vm0 = vcmask 523264   ;;  %s251_s0 = inlined_call_operand.vmem [shape: bf16[32,64], index: 0, kind: input, shape index: {}]   ;;  %s252_s1 = inlined_call_operand.vmem [shape: bf16[64,32], index: 1, kind: input, shape index: {}]   ;;  %s253_s2 = inlined_call_operand.vmem [shape: f32[1,32], index: 2, kind: input, shape index: {}]   ;;  %s254_s3 = inlined_call_operand.hbm [shape: f32[32,32], index: 3, kind: output, shape index: {}]  }
   0x1   :  { %v176_v0 = vld [vmem:[%s252_s1 + $0x18] sm:$0xff]   ;;  %v177_v1 = vld [vmem:[%s252_s1 + $0x10] sm:$0xff]   ;;  %v178_v2 = vld [vmem:[%s252_s1 + $0x8] sm:$0xff]  }
   0x2   :  { %161 = vmatprep.subr.bf16.mxu0 %v176_v0  ;;  %v180_v3 = vld [vmem:[%s251_s0] sm:$0xff]  }
   0x3   :  { %162 = vmatpush3.bf16.msra.mxu0 %v176_v0  ;;  %169 = vmatprep.mubr.msk.bf16.mxu0 %vm69_vm0, %v180_v3 }
   0x4   :  { %163 = vmatprep.subr.bf16.mxu0 %v177_v1 }
   0x5   :  { %8 = vsyncpa [#allocation3], 0  ;;  %v179_v4 = vld [vmem:[%s252_s1] sm:$0xff]   ;;  %v181_v5 = vld [vmem:[%s251_s0 + $0x8] sm:$0xff]   ;;  %vm125_vm1 = vcmask 261120   ;;  %s204_s26 = smov [#allocation2]  }
   0x6   :  { %v146_v6 = vld [vmem:[%s253_s2] ss:$0 sm:$0xff]  ;;  %s135_s1 = sshll.u32 %s204_s26, 4  ;;  %s136_s1 = int_to_ptr.vmem [resolvable:$true] %s135_s1 }
   0x7   :  { %164 = vmatpush3.bf16.msra.mxu0 %v177_v1  ;;  %s182_s0 = scalar_lea.vmem %s136_s1, 512  ;;  %p187_p1 = scmp.lt.s32.totalorder %s136_s1, %s136_s1 }
   0x8   :  { %165 = vmatprep.subr.bf16.mxu0 %v178_v2  ;;  %p183_p0 = scmp.ne.s32.totalorder %s136_s1, %s182_s0  ;;  %p188_p2 = scmp.lt.s32.totalorder %s182_s0, %s182_s0 }
   0xa   :  { %p189_p3 = por %p188_p2, %p187_p1 }
   0xb   :  { %166 = vmatpush3.bf16.msra.mxu0 %v178_v2 }
   0xc   :  { %167 = vmatprep.subr.bf16.mxu0 %v179_v4  ;;  %p190_p4 = pnand %p189_p3, %p183_p0 }
   0xf   :  { %168 = vmatpush3.bf16.msra.mxu0 %v179_v4 }
  0x12   :  { %170 = vmatmul.mubr.msk.bf16.vlgmr.msra.gmra.mxu0 %vm69_vm0, %v181_v5 }
  0xd2   :  { %v171_v7 = vpop.f32.mrf.mxu0 }
  0xd3   :  { %v119_v8 = vadd.f32 %v171_v7, %v146_v6 }
  0xd4   :  { %v110_v9 = vpop.f32.mrf.mxu0 }
  0xd5   :  { %128 = vst.msk [vmem:[#allocation2 + $0x10] sm:$0xff] %vm125_vm1, %v119_v8  ;;  %v111_v10 = vadd.f32 %v146_v6, %v110_v9 }
  0xd6   :  { %v172_v11 = vpop.f32.mrf.mxu0 }
  0xd7   :  { %126 = vst.msk [vmem:[#allocation2] sm:$0xff] %vm125_vm1, %v111_v10  ;;  %v122_v12 = vadd.f32 %v172_v11, %v146_v6 }
  0xd8   :  { %v113_v13 = vpop.f32.mrf.mxu0 }
  0xd9   :  { %129 = vst.msk [vmem:[#allocation2 + $0x18] sm:$0xff] %vm125_vm1, %v122_v12  ;;  %v114_v14 = vadd.f32 %v146_v6, %v113_v13 }
  0xdb   :  { %127 = vst.msk [vmem:[#allocation2 + $0x8] sm:$0xff] %vm125_vm1, %v114_v14 }
  0xdc   :  { %193 = shalt.err (!%p190_p4)
}
  0xdd   :  { %s205_s2 = smov 128   ;;  %s206_s27 = smov 8  }
  0xde   :  { %141 = dma.vmem_to_hbm [thread:$0]  %s136_s1, 512, %s254_s3, [#allocation3], %s205_s2, %s205_s2, %s206_s27  }
  0xdf   :  { %202 = dma.done.wait [#allocation3], 512  }
  0xe0   :  { %203 = vsyncadd [#allocation3], 4294966784 }
  0xe1   :  { %145 = vsyncpa [#allocation3], 1 }

</bundles_post_ra>
